<compile_context>
chip_gen: v7x
topology: tpu7x:2x2x1
jax: 0.10.0
libtpu: 0.0.40
codegen_flags: <defaults>
</compile_context>

<pallas_src>
import math
import jax
import jax.numpy as jnp
from jax import lax
from jax.experimental import pallas as pl
from jax.experimental.pallas import tpu as pltpu


def _round_up(x, m):
    return ((x + m - 1) // m) * m


def _tile_caps(itemsize):
    """Generation-aware tile caps and scoped-VMEM limit."""
    try:
        vmem_cap = pltpu.get_tpu_info().vmem_capacity_bytes
    except Exception:
        vmem_cap = 64 * 1024 * 1024  # be conservative (v7x-like) if unknown
    if vmem_cap >= 96 * 1024 * 1024:
        # v5e / v6e: 128 MiB VMEM -> big tiles for arithmetic intensity.
        tm_cap, tn_cap, tk_cap = 1024, 512, 1024
        vmem_limit = 64 * 1024 * 1024
    else:
        # v7x: 64 MiB per TensorCore -> keep the double-buffered set small.
        tm_cap, tn_cap = 512, 512
        tk_cap = 1024 if itemsize <= 2 else 512
        vmem_limit = 32 * 1024 * 1024
    return tm_cap, tn_cap, tk_cap, vmem_limit


def _linear_kernel_f32out(x_ref, w_ref, b_ref, o_ref):
    # x_ref: [tm, tk]  w_ref: [tn, tk]  b_ref: [1, tn]  o_ref: [tm, tn] (f32)
    # o_ref's block index is (i, j) -> resident across the k axis, so it is the
    # accumulator itself (no scratch, no final copy).
    k = pl.program_id(2)

    @pl.when(k == 0)
    def _():
        o_ref[...] = jnp.zeros_like(o_ref)

    o_ref[...] += lax.dot_general(
        x_ref[...], w_ref[...],
        dimension_numbers=(((1,), (1,)), ((), ())),   # x @ W^T, no transpose materialized
        preferred_element_type=jnp.float32,
    )

    @pl.when(k == pl.num_programs(2) - 1)
    def _():
        o_ref[...] += b_ref[...]


def _linear_kernel_lowp_out(x_ref, w_ref, b_ref, o_ref, acc_ref):
    # Same as above but with an f32 VMEM accumulator for low-precision outputs.
    k = pl.program_id(2)

    @pl.when(k == 0)
    def _():
        acc_ref[...] = jnp.zeros_like(acc_ref)

    acc_ref[...] += lax.dot_general(
        x_ref[...], w_ref[...],
        dimension_numbers=(((1,), (1,)), ((), ())),
        preferred_element_type=jnp.float32,
    )

    @pl.when(k == pl.num_programs(2) - 1)
    def _():
        o_ref[...] = (acc_ref[...] + b_ref[...]).astype(o_ref.dtype)


def group_linear(x, weight, bias, *, use_bf16=True, allow_fast_path=True,
                 tm=None, tn=None, tk=None):
    """y = x @ weight.T + bias  (semantics of torch.nn.Linear).

    x:      [..., in_dim]
    weight: [out_dim, in_dim]
    bias:   [out_dim]
    """
    in_dim = x.shape[-1]
    out_dim = weight.shape[0]
    lead_shape = x.shape[:-1]
    out_dtype = x.dtype

    x2d = x.reshape(-1, in_dim)                     # [M, K]
    M, K, N = x2d.shape[0], in_dim, out_dim

    # Small-problem fast path: grid-step overhead + padding would dwarf the dot.
    if allow_fast_path and (2 * M * N * K < (1 << 20) or M < 8):
        y = (x2d @ weight.T + bias).astype(out_dtype)
        return y.reshape(*lead_shape, out_dim)

    # Feed the MXU bf16 (f32 accumulation is preserved via preferred_element_type).
    compute_dtype = jnp.bfloat16 if (use_bf16 and x.dtype == jnp.float32) else x.dtype
    isz = jnp.dtype(compute_dtype).itemsize
    sub = 8 if isz == 4 else (16 if isz == 2 else 32)   # packed second-minor multiple

    tm_cap, tn_cap, tk_cap, vmem_limit = _tile_caps(isz)

    # Tile selection: full-dim blocks for small dims (always legal), otherwise
    # capped blocks whose second-minor dims respect the packing multiple and
    # whose lane dims are 128-multiples (unmasked stores except ragged tails).
    if tm is None:
        tm = M if M <= tm_cap else tm_cap
    if tn is None:
        tn = N if N <= tn_cap else tn_cap
    if tk is None:
        tk = K if K <= tk_cap else tk_cap

    # Ensure >= 2 output tiles so both v7x TensorCores get work via the
    # "parallel" grid axes (harmless on single-core chips).
    if pl.cdiv(M, tm) * pl.cdiv(N, tn) < 2:
        if M > sub:
            tm = min(tm, _round_up(pl.cdiv(M, 2), sub))
        elif N > 128:
            tn = min(tn, _round_up(pl.cdiv(N, 2), 128))

    # Only the reduction axis ever needs explicit zero padding (ragged K blocks
    # would feed garbage into the accumulation); ragged M / N blocks are safe.
    Kp = K
    xc = x2d.astype(compute_dtype)
    wc = weight.astype(compute_dtype)
    if K > tk and K % tk != 0:
        Kp = _round_up(K, tk)
        xc = jnp.pad(xc, ((0, 0), (0, Kp - K)))
        wc = jnp.pad(wc, ((0, 0), (0, Kp - K)))
    b2d = bias.reshape(1, N).astype(jnp.float32)

    grid = (pl.cdiv(M, tm), pl.cdiv(N, tn), pl.cdiv(Kp, tk))

    if out_dtype == jnp.float32:
        kernel = _linear_kernel_f32out
        scratch = []
    else:
        kernel = _linear_kernel_lowp_out
        scratch = [pltpu.VMEM((tm, tn), jnp.float32)]

    cost = pl.CostEstimate(
        flops=2 * M * N * Kp,
        transcendentals=0,
        bytes_accessed=(M * Kp + N * Kp) * isz + N * 4
        + M * N * jnp.dtype(out_dtype).itemsize,
    )

    out = pl.pallas_call(
        kernel,
        out_shape=jax.ShapeDtypeStruct((M, N), out_dtype),
        grid_spec=pltpu.PrefetchScalarGridSpec(
            num_scalar_prefetch=0,
            grid=grid,
            in_specs=[
                pl.BlockSpec((tm, tk), lambda i, j, k: (i, k)),   # x tile
                pl.BlockSpec((tn, tk), lambda i, j, k: (j, k)),   # weight tile ([N, K] layout)
                pl.BlockSpec((1, tn), lambda i, j, k: (0, j)),    # bias tile
            ],
            out_specs=pl.BlockSpec((tm, tn), lambda i, j, k: (i, j)),
            scratch_shapes=scratch,
        ),
        compiler_params=pltpu.CompilerParams(
            dimension_semantics=("parallel", "parallel", "arbitrary"),
            vmem_limit_bytes=vmem_limit,
        ),
        cost_estimate=cost,
    )(xc, wc, b2d)

    return out.reshape(*lead_shape, out_dim)


if __name__ == "__main__":
    # Shapes implied by the module: any [..., in_dim] input -> [..., out_dim].
    batch, seq, in_dim, out_dim = 2, 8, 32, 64

    key = jax.random.PRNGKey(0)
    kx, kw, kb = jax.random.split(key, 3)

    # Deterministic parameter init mimicking the module's __init__:
    # uniform(-a, a) with a = 1/sqrt(out_dim).
    a = 1.0 / math.sqrt(out_dim)
    weight = jax.random.uniform(kw, (out_dim, in_dim), jnp.float32, -a, a)
    bias = jax.random.uniform(kb, (out_dim,), jnp.float32, -a, a)

    x = jax.random.normal(kx, (batch, seq, in_dim), jnp.float32)
    y_ref = x @ weight.T + bias

    # 1) Pallas kernel, bf16-MXU path (fast path disabled so the kernel runs).
    y = jax.block_until_ready(group_linear(x, weight, bias, allow_fast_path=False))
    assert y.shape == (batch, seq, out_dim) and y.dtype == x.dtype
    # Tight check vs. a reference with the same bf16 rounding of the MXU inputs.
    xb = x.astype(jnp.bfloat16).astype(jnp.float32)
    wb = weight.astype(jnp.bfloat16).astype(jnp.float32)
    y_ref_bf16 = xb @ wb.T + bias
    assert jnp.allclose(y, y_ref_bf16, atol=1e-4, rtol=1e-4), "bf16 path mismatch"
    # Loose check vs. pure-f32 reference (bf16 input-rounding error only).
    assert jnp.allclose(y, y_ref, atol=3e-2, rtol=3e-2), "bf16 path far from f32 ref"

    # 2) Pallas kernel, exact f32 path.
    y32 = jax.block_until_ready(
        group_linear(x, weight, bias, use_bf16=False, allow_fast_path=False))
    assert jnp.allclose(y32, y_ref, atol=1e-5, rtol=1e-5), "f32 path mismatch"

    # 3) Small-problem fast path (plain XLA dot).
    yfp = jax.block_until_ready(group_linear(x, weight, bias))
    assert jnp.allclose(yfp, y_ref, atol=1e-5, rtol=1e-5), "fast path mismatch"

    print("KERNEL_OK")
</pallas_src>

<mosaic_0001>
module attributes {stable_mosaic.version = 11 : i64} {
  func.func @_linear_kernel_f32out(%arg0: i32, %arg1: i32, %arg2: i32, %arg3: memref<16x32xbf16, #tpu.memory_space<vmem>>, %arg4: memref<64x32xbf16, #tpu.memory_space<vmem>>, %arg5: memref<1x64xf32, #tpu.memory_space<vmem>>, %arg6: memref<16x64xf32, #tpu.memory_space<vmem>>) attributes {dimension_semantics = [#tpu.dimension_semantics<parallel>, #tpu.dimension_semantics<parallel>, #tpu.dimension_semantics<arbitrary>], iteration_bounds = array<i64: 1, 1, 1>, scalar_prefetch = 0 : i64, scratch_operands = 0 : i64, tpu.core_type = #tpu.core_type<tc>, window_params = [{transform_indices = @transform_0, window_bounds = array<i64: 16, 32>}, {transform_indices = @transform_1, window_bounds = array<i64: 64, 32>}, {transform_indices = @transform_2, window_bounds = array<i64: 1, 64>}, {transform_indices = @transform_3, window_bounds = array<i64: 16, 64>}]} {
    %c0_i32 = arith.constant 0 : i32
    %0 = arith.cmpi eq, %arg2, %c0_i32 : i32
    %1 = arith.extui %0 : i1 to i32
    %c0_i32_0 = arith.constant 0 : i32
    %2 = arith.cmpi ne, %1, %c0_i32_0 : i32
    scf.if %2 {
      %cst_10 = arith.constant 0.000000e+00 : f32
      %12 = vector.broadcast %cst_10 : f32 to vector<16x64xf32>
      %c0_11 = arith.constant 0 : index
      %c0_12 = arith.constant 0 : index
      %13 = vector.load %arg6[%c0_11, %c0_12] : memref<16x64xf32, #tpu.memory_space<vmem>>, vector<16x64xf32>
      tpu.vector_store %arg6[%c0_11, %c0_12], %12 {strides = array<i32>} : memref<16x64xf32, #tpu.memory_space<vmem>>, vector<16x64xf32>,
    } else {
    }
    %c0 = arith.constant 0 : index
    %c0_1 = arith.constant 0 : index
    %3 = vector.load %arg6[%c0, %c0_1] : memref<16x64xf32, #tpu.memory_space<vmem>>, vector<16x64xf32>
    %c0_2 = arith.constant 0 : index
    %c0_3 = arith.constant 0 : index
    %4 = vector.load %arg3[%c0_2, %c0_3] : memref<16x32xbf16, #tpu.memory_space<vmem>>, vector<16x32xbf16>
    %c0_4 = arith.constant 0 : index
    %c0_5 = arith.constant 0 : index
    %5 = vector.load %arg4[%c0_4, %c0_5] : memref<64x32xbf16, #tpu.memory_space<vmem>>, vector<64x32xbf16>
    %cst = arith.constant dense<0.000000e+00> : vector<16x64xf32>
    %6 = tpu.matmul %4, %5, %cst {dimension_numbers = #tpu.dot_dimension_numbers<[1], [1], [0], [0], [0, 0, 1, 0], [], []>} : vector<16x32xbf16>, vector<64x32xbf16>, vector<16x64xf32> -> vector<16x64xf32>
    %7 = arith.addf %3, %6 : vector<16x64xf32>
    %c0_6 = arith.constant 0 : index
    %c0_7 = arith.constant 0 : index
    %8 = vector.load %arg6[%c0_6, %c0_7] : memref<16x64xf32, #tpu.memory_space<vmem>>, vector<16x64xf32>
    tpu.vector_store %arg6[%c0_6, %c0_7], %7 {strides = array<i32>} : memref<16x64xf32, #tpu.memory_space<vmem>>, vector<16x64xf32>,
    %c0_i32_8 = arith.constant 0 : i32
    %9 = arith.cmpi eq, %arg2, %c0_i32_8 : i32
    %10 = arith.extui %9 : i1 to i32
    %c0_i32_9 = arith.constant 0 : i32
    %11 = arith.cmpi ne, %10, %c0_i32_9 : i32
    scf.if %11 {
      %c0_10 = arith.constant 0 : index
      %c0_11 = arith.constant 0 : index
      %12 = vector.load %arg6[%c0_10, %c0_11] : memref<16x64xf32, #tpu.memory_space<vmem>>, vector<16x64xf32>
      %c0_12 = arith.constant 0 : index
      %c0_13 = arith.constant 0 : index
      %13 = vector.load %arg5[%c0_12, %c0_13] : memref<1x64xf32, #tpu.memory_space<vmem>>, vector<1x64xf32>
      %14 = vector.broadcast %13 : vector<1x64xf32> to vector<16x64xf32>
      %15 = arith.addf %12, %14 : vector<16x64xf32>
      %c0_14 = arith.constant 0 : index
      %c0_15 = arith.constant 0 : index
      %16 = vector.load %arg6[%c0_14, %c0_15] : memref<16x64xf32, #tpu.memory_space<vmem>>, vector<16x64xf32>
      tpu.vector_store %arg6[%c0_14, %c0_15], %15 {strides = array<i32>} : memref<16x64xf32, #tpu.memory_space<vmem>>, vector<16x64xf32>,
    } else {
    }
    return
  }
  func.func @transform_0(%arg0: i32, %arg1: i32, %arg2: i32) -> (i32, i32) {
    %c0_i32 = arith.constant 0 : i32
    return %arg0, %arg2 : i32, i32
  }
  func.func @transform_1(%arg0: i32, %arg1: i32, %arg2: i32) -> (i32, i32) {
    %c0_i32 = arith.constant 0 : i32
    return %arg1, %arg2 : i32, i32
  }
  func.func @transform_2(%arg0: i32, %arg1: i32, %arg2: i32) -> (i32, i32) {
    %c0_i32 = arith.constant 0 : i32
    %c0_i32_0 = arith.constant 0 : i32
    return %c0_i32, %arg1 : i32, i32
  }
  func.func @transform_3(%arg0: i32, %arg1: i32, %arg2: i32) -> (i32, i32) {
    %c0_i32 = arith.constant 0 : i32
    return %arg0, %arg1 : i32, i32
  }
}

</mosaic_0001>

<bundles_post_ra>
// kernel: tpu_custom_call.1
= control target key start
LH: loop header
LB: loop body
LE: loop exit
PB: predicated region body
PF: predicated region fallthrough
CT: control target
= control target key end

     0   :  { %v212_v1 = vmov 0.0   ;;  %vm60_vm0 = vcmask 261120   ;;  %vm213_vm1 = vmmov 0   ;;  %vm20_vm2 = vcmask 523264   ;;  %s278_s0 = inlined_call_operand.vmem [shape: bf16[16,32], index: 0, kind: input, shape index: {}]   ;;  %s279_s1 = inlined_call_operand.vmem [shape: bf16[64,32], index: 1, kind: input, shape index: {}]   ;;  %s280_s2 = inlined_call_operand.vmem [shape: f32[1,64], index: 2, kind: input, shape index: {}]   ;;  %s281_s3 = inlined_call_operand.hbm [shape: f32[16,64], index: 3, kind: output, shape index: {}]  }
   0x1   :  { %v183_v0 = vld [vmem:[%s279_s1] sm:$0xff]   ;;  %166 = vmatprep.subr.bf16.mxu0 %v212_v1  ;;  %v184_v3 = vld [vmem:[%s279_s1 + $0x8] sm:$0xff]   ;;  %174 = vmatprep.mubr.msk.bf16.mxu0 %vm213_vm1, %v212_v1 }
   0x2   :  { %v65_v2 = vsel %vm60_vm0, %v183_v0, 0 }
   0x3   :  { %167 = vmatpush3.bf16.xpose.msra.mxu0 %v65_v2 }
   0x4   :  { %168 = vmatprep.subr.bf16.mxu0 %v212_v1 }
   0x5   :  { %8 = vsyncpa [#allocation3], 0  ;;  %21 = vst.msk [vmem:[#allocation2] sm:$0xff] %vm20_vm2, %v212_v1  ;;  %v68_v4 = vsel %vm60_vm0, %v184_v3, 0  ;;  %v185_v5 = vld [vmem:[%s279_s1 + $0x10] sm:$0xff]   ;;  %v186_v7 = vld [vmem:[%s279_s1 + $0x18] sm:$0xff]  }
   0x6   :  { %22 = vst.msk [vmem:[#allocation2 + $0x8] sm:$0xff] %vm20_vm2, %v212_v1  ;;  %v71_v6 = vsel %vm60_vm0, %v185_v5, 0  ;;  %v74_v8 = vsel %vm60_vm0, %v186_v7, 0  ;;  %v187_v9 = vld [vmem:[%s278_s0] sm:$0xff]   ;;  %s214_s23 = smov [#allocation2]  }
   0x7   :  { %v160_v18 = vld [vmem:[%s280_s2] ss:$0 sm:$0xff]  ;;  %s143_s0 = sshll.u32 %s214_s23, 4  ;;  %s144_s0 = int_to_ptr.vmem [resolvable:$true] %s143_s0 }
   0x8   :  { %s188_s24 = scalar_lea.vmem %s144_s0, 256  ;;  %p193_p1 = scmp.lt.s32.totalorder %s144_s0, %s144_s0 }
   0x9   :  { %p189_p0 = scmp.ne.s32.totalorder %s144_s0, %s188_s24  ;;  %p194_p2 = scmp.lt.s32.totalorder %s188_s24, %s188_s24 }
   0xb   :  { %169 = vmatpush3.bf16.xpose.msra.mxu0 %v68_v4  ;;  %p195_p3 = por %p194_p2, %p193_p1 }
   0xc   :  { %170 = vmatprep.subr.bf16.mxu0 %v212_v1  ;;  %v23_v10 = vld [vmem:[#allocation2] sm:$0xff] }
   0xd   :  { %v24_v12 = vld [vmem:[#allocation2 + $0x8] sm:$0xff]  ;;  %p196_p4 = pnand %p195_p3, %p189_p0 }
  0x13   :  { %171 = vmatpush3.bf16.xpose.msra.mxu0 %v71_v6 }
  0x14   :  { %172 = vmatprep.subr.bf16.mxu0 %v212_v1 }
  0x1b   :  { %173 = vmatpush3.bf16.xpose.msra.mxu0 %v74_v8 }
  0x22   :  { %175 = vmatmul.mubr.msk.bf16.vlgmr.msra.gmra.mrb[0].mxu0 %vm60_vm0, %v187_v9 }
  0xf5   :  { %v110_v11 = vpop.f32.mrb[0].mxu0 }
  0xf6   :  { %v117_v13 = vadd.f32 %v110_v11, %v23_v10  ;;  %v176_v14 = vpop.f32.mrb[1].mxu0 }
  0xf7   :  { %v113_v15 = vpop.f32.mrb[2].mxu0 }
  0xf8   :  { %120 = vst.msk [vmem:[#allocation2] sm:$0xff] %vm20_vm2, %v117_v13  ;;  %v118_v16 = vadd.f32 %v113_v15, %v24_v12  ;;  %v177_v17 = vpop.f32.mrb[3].mxu0 }
  0xfa   :  { %121 = vst.msk [vmem:[#allocation2 + $0x8] sm:$0xff] %vm20_vm2, %v118_v16 }
  0xff   :  { %v125_v19 = vld [vmem:[#allocation2] sm:$0xff] }
 0x100   :  { %v134_v20 = vadd.f32 %v160_v18, %v125_v19 }
 0x101   :  { %v126_v21 = vld [vmem:[#allocation2 + $0x8] sm:$0xff] }
 0x102   :  { %v135_v22 = vadd.f32 %v160_v18, %v126_v21  ;;  %136 = vst.msk [vmem:[#allocation2] sm:$0xff] %vm20_vm2, %v134_v20 }
 0x104   :  { %137 = vst.msk [vmem:[#allocation2 + $0x8] sm:$0xff] %vm20_vm2, %v135_v22 }
 0x105   :  { %199 = shalt.err (!%p196_p4)
}
 0x106   :  { %s200_s26 = scalar_lea.hbm %s281_s3, 256 }
 0x107   :  { %p201_p5 = scmp.ne.s32.totalorder %s281_s3, %s200_s26  ;;  %p204_p6 = scmp.lt.u32.totalorder %s200_s26, %s281_s3 }
 0x109   :  { %p206_p7 = pnand %p204_p6, %p201_p5 }
 0x10b   :  { %209 = shalt.err (!%p206_p7)
}
 0x10c   :  { %s215_s4 = smov 128   ;;  %s216_s5 = smov 8  }
 0x10d   :  { %149 = dma.vmem_to_hbm [thread:$0]  %s144_s0, 256, %s281_s3, [#allocation3], %s215_s4, %s215_s4, %s216_s5  }
 0x10e   :  { %210 = dma.done.wait [#allocation3], 256  }
 0x10f   :  { %211 = vsyncadd [#allocation3], 4294967040 }
 0x110   :  { %153 = vsyncpa [#allocation3], 1 }

</bundles_post_ra>
